<compile_context>
chip_gen: v7x
topology: tpu7x:2x2x1
jax: 0.10.0
libtpu: 0.0.40
codegen_flags: <defaults>
</compile_context>

<pallas_src>
import jax
import jax.numpy as jnp
from jax.experimental import pallas as pl
from jax.experimental.pallas import tpu as pltpu


# --------------------------------------------------------------------------- utils
def _vmem_budget_bytes() -> int:
    """Scoped-VMEM budget per generation: ~40 MiB on v7x (64 MiB physical),
    up to ~96 MiB on v5e/v6e (128 MiB physical)."""
    cap = 64 * 1024 * 1024
    try:
        cap = int(getattr(pltpu.get_tpu_info(), "vmem_capacity_bytes", cap) or cap)
    except Exception:
        pass
    return min(int(cap * 0.65), 96 * 1024 * 1024)


def _alignments(dtype):
    """(sublane, lane) alignment: sub-32-bit dtypes pack 2/4 rows per sublane and
    want 256-wide lane tiles for the v6e/v7x 256x256 MXU; f32 keeps (8, 128)."""
    itemsize = jnp.dtype(dtype).itemsize
    if itemsize >= 4:
        return 8, 128
    if itemsize == 2:
        return 16, 256
    return 32, 256


def _pick_tile(dim, target, align):
    """Largest `align`-multiple divisor of `dim` that is <= target (full dim if it
    already fits). Returns None when no aligned divisor exists (caller pads)."""
    if dim <= target:
        return dim
    t = (target // align) * align
    while t >= align:
        if dim % t == 0:
            return t
        t -= align
    return None


def _pad_axis(arr, axis, multiple):
    pad = (-arr.shape[axis]) % multiple
    if pad == 0:
        return arr
    widths = [(0, 0)] * arr.ndim
    widths[axis] = (0, pad)
    return jnp.pad(arr, widths)


def _get_activation_fn(name: str):
    if name == "relu":
        return lambda x: jnp.maximum(x, 0.0)
    if name == "gelu":
        # TODO(synk): PyTorch F.gelu is exact (erf-based); tanh approximation used here.
        return lambda x: jax.nn.gelu(x, approximate=True)
    if name == "swish":
        return jax.nn.silu
    raise NotImplementedError(name)


# ------------------------------------------------ fused Linear (+ bias + act [+ LN])
def _make_linear_kernel(*, act_fn, has_bias, fuse_ln, ln_has_bias, ln_eps, use_acc):
    def kernel(*refs):
        it = iter(refs)
        x_ref = next(it)
        w_ref = next(it)
        b_ref = next(it) if has_bias else None
        lnw_ref = next(it) if fuse_ln else None
        lnb_ref = next(it) if (fuse_ln and ln_has_bias) else None
        o_ref = next(it)
        acc_ref = next(it) if use_acc else o_ref   # f32 output: accumulate in place

        k = pl.program_id(2)

        @pl.when(k == 0)
        def _init():
            acc_ref[...] = jnp.zeros_like(acc_ref)

        acc_ref[...] += jnp.dot(x_ref[...], w_ref[...],
                                preferred_element_type=jnp.float32)

        @pl.when(k == pl.num_programs(2) - 1)
        def _epilogue():
            y = acc_ref[...]
            if has_bias:
                y = y + b_ref[...].astype(jnp.float32)
            if act_fn is not None:
                y = act_fn(y)  # activation in f32, matching `activation_fn(x.float())`
            if fuse_ln:
                # Whole row (width F) is resident in the block -> LayerNorm fused here.
                mean = jnp.mean(y, axis=-1, keepdims=True)
                cent = y - mean
                var = jnp.mean(cent * cent, axis=-1, keepdims=True)  # two-pass, stable
                y = cent * jax.lax.rsqrt(var + ln_eps) * lnw_ref[...].astype(jnp.float32)
                if ln_has_bias:
                    y = y + lnb_ref[...].astype(jnp.float32)
            o_ref[...] = y.astype(o_ref.dtype)

    return kernel


def linear_act(x, w, b=None, *, act_fn=None, ln_w=None, ln_b=None, ln_eps=1e-5,
               tm_target=512, tn_target=1024, tk_target=1024):
    """y = [LayerNorm](act(x @ w [+ b])); x:(M,K), w:(K,N), b:(N,).
    LayerNorm over the last dim is fused into the epilogue when ln_w is given."""
    M, K = x.shape
    Kw, N = w.shape
    assert K == Kw
    out_dtype = x.dtype
    itemsize = jnp.dtype(x.dtype).itemsize
    m_align, lane_align = _alignments(x.dtype)
    budget = _vmem_budget_bytes()

    has_bias = b is not None
    fuse_ln = ln_w is not None
    ln_has_bias = fuse_ln and (ln_b is not None)

    if fuse_ln:
        # Whole (tm, N) f32 row block is resident for the LN epilogue; cap tm and tk
        # so it plus the double-buffered (tk, N) weight tiles fit the VMEM budget.
        max_tm = ((budget // 4) // (N * 4)) // m_align * m_align
        tm_target = max(m_align, min(tm_target, max_tm))
        max_tk = ((budget // 2) // (2 * N * itemsize)) // lane_align * lane_align
        tk_target = max(lane_align, min(tk_target, max_tk))

    orig_M, orig_N = M, N
    xp, wp, bp = x, w, b

    tm = _pick_tile(M, tm_target, m_align)
    if tm is None:                                 # no aligned divisor -> pad minimally
        tm = tm_target
        xp = _pad_axis(xp, 0, tm)
        M = xp.shape[0]

    tk = _pick_tile(K, tk_target, lane_align)
    if tk is None:
        tk = tk_target
        xp = _pad_axis(xp, 1, tk)
        wp = _pad_axis(wp, 0, tk)
        K = xp.shape[1]

    if fuse_ln:
        tn = N                                     # full F width (never padded: LN stats)
    else:
        tn = _pick_tile(N, tn_target, lane_align)
        if tn is None:
            tn = tn_target
            wp = _pad_axis(wp, 1, tn)
            if bp is not None:
                bp = _pad_axis(bp, 0, tn)
            N = wp.shape[1]

    # v7x has 2 TensorCores sharing the grid: keep >=2 blocks on a parallel axis
    # for problems large enough to care about.
    if M // tm == 1 and N // tn == 1 and M >= 256:
        half = _pick_tile(M, max(m_align, (tm // 2) // m_align * m_align), m_align)
        if half is not None and half < tm:
            tm = half

    grid = (M // tm, N // tn, K // tk)
    use_acc = jnp.dtype(out_dtype) != jnp.dtype(jnp.float32)

    inputs = [xp, wp]
    in_specs = [
        pl.BlockSpec((tm, tk), lambda i, j, k: (i, k)),
        pl.BlockSpec((tk, tn), lambda i, j, k: (k, j)),
    ]
    if has_bias:
        inputs.append(bp.reshape(1, N))
        in_specs.append(pl.BlockSpec((1, tn), lambda i, j, k: (0, j)))
    if fuse_ln:
        inputs.append(ln_w.reshape(1, N))
        in_specs.append(pl.BlockSpec((1, tn), lambda i, j, k: (0, j)))
        if ln_has_bias:
            inputs.append(ln_b.reshape(1, N))
            in_specs.append(pl.BlockSpec((1, tn), lambda i, j, k: (0, j)))

    cost = pl.CostEstimate(
        flops=2 * M * N * K + (10 * M * N if fuse_ln else 0),
        transcendentals=(M * N if act_fn is not None else 0) + (M if fuse_ln else 0),
        bytes_accessed=(M * K + K * N + M * N) * itemsize,
    )

    kernel = _make_linear_kernel(act_fn=act_fn, has_bias=has_bias, fuse_ln=fuse_ln,
                                 ln_has_bias=ln_has_bias, ln_eps=ln_eps, use_acc=use_acc)
    out = pl.pallas_call(
        kernel,
        out_shape=jax.ShapeDtypeStruct((M, N), out_dtype),
        grid=grid,
        in_specs=in_specs,
        out_specs=pl.BlockSpec((tm, tn), lambda i, j, k: (i, j)),
        scratch_shapes=[pltpu.VMEM((tm, tn), jnp.float32)] if use_acc else [],
        compiler_params=pltpu.CompilerParams(
            dimension_semantics=("parallel", "parallel", "arbitrary"),
            vmem_limit_bytes=budget,
        ),
        cost_estimate=cost,
    )(*inputs)

    if M != orig_M or N != orig_N:
        out = out[:orig_M, :orig_N]
    return out


# ---------------------------------------- standalone LayerNorm (fallback, unfused path)
def _make_layer_norm_kernel(*, eps, has_bias):
    def kernel(*refs):
        x_ref, w_ref = refs[0], refs[1]
        b_ref = refs[2] if has_bias else None
        o_ref = refs[-1]
        x = x_ref[...].astype(jnp.float32)
        mean = jnp.mean(x, axis=-1, keepdims=True)
        cent = x - mean
        var = jnp.mean(cent * cent, axis=-1, keepdims=True)
        y = cent * jax.lax.rsqrt(var + eps) * w_ref[...].astype(jnp.float32)
        if has_bias:
            y = y + b_ref[...].astype(jnp.float32)
        o_ref[...] = y.astype(o_ref.dtype)
    return kernel


def layer_norm(x2, weight, bias=None, *, eps=1e-5, row_tile_target=2048):
    """LayerNorm over the last dim of a 2-D (rows, H) array (used when LN is not fused)."""
    rows, h = x2.shape
    m_align, _ = _alignments(x2.dtype)
    itemsize = jnp.dtype(x2.dtype).itemsize
    budget = _vmem_budget_bytes()
    # in + out, double-buffered each: 4 * tile * h * itemsize kept under ~half the budget.
    cap = ((budget // 2) // (4 * h * itemsize)) // m_align * m_align
    target = max(m_align, min(row_tile_target, cap))

    orig_rows = rows
    xp = x2
    tm = _pick_tile(rows, target, m_align)
    if tm is None:
        tm = target
        xp = _pad_axis(xp, 0, tm)
        rows = xp.shape[0]

    has_bias = bias is not None
    inputs = [xp, weight.reshape(1, h)]
    in_specs = [
        pl.BlockSpec((tm, h), lambda i: (i, 0)),
        pl.BlockSpec((1, h), lambda i: (0, 0)),
    ]
    if has_bias:
        inputs.append(bias.reshape(1, h))
        in_specs.append(pl.BlockSpec((1, h), lambda i: (0, 0)))

    cost = pl.CostEstimate(flops=8 * rows * h, transcendentals=rows,
                           bytes_accessed=2 * rows * h * itemsize)
    kernel = _make_layer_norm_kernel(eps=eps, has_bias=has_bias)
    out = pl.pallas_call(
        kernel,
        out_shape=jax.ShapeDtypeStruct((rows, h), x2.dtype),
        grid=(rows // tm,),
        in_specs=in_specs,
        out_specs=pl.BlockSpec((tm, h), lambda i: (i, 0)),
        compiler_params=pltpu.CompilerParams(
            dimension_semantics=("parallel",),
            vmem_limit_bytes=budget,
        ),
        cost_estimate=cost,
    )(*inputs)
    if rows != orig_rows:
        out = out[:orig_rows]
    return out


# ------------------------------------------------------------------- FFN forward
def feed_forward_network(x, params, *, activation_fn="gelu", subln=False,
                         use_bias=True, layernorm_eps=1e-6):
    """Forward pass of FeedForwardNetwork (eval mode: dropout is identity)."""
    # TODO(synk): training-mode nn.Dropout (dropout / activation_dropout) not implemented;
    #             eval-mode identity is used.
    act = _get_activation_fn(activation_fn)
    x_shape = x.shape
    x2 = x.reshape(-1, x_shape[-1])
    ffn_dim = params["w1"].shape[1]

    b1 = params["b1"] if use_bias else None
    b2 = params["b2"] if use_bias else None
    # UnitLayerNorm (use_bias=False) keeps a registered zeros buffer as "bias": skip it.
    ln_b = params["ln_b"] if use_bias else None

    # Fuse activation + ffn_layernorm into the fc1 epilogue whenever the (tm, F) f32
    # row block + (tk, F) weight tiles fit comfortably in VMEM (typical ffn dims do).
    fuse_ln = subln and ffn_dim <= 8192

    if fuse_ln:
        h = linear_act(x2, params["w1"], b1, act_fn=act,
                       ln_w=params["ln_w"], ln_b=ln_b, ln_eps=layernorm_eps)
    else:
        h = linear_act(x2, params["w1"], b1, act_fn=act)
        if subln:
            h = layer_norm(h, params["ln_w"], ln_b, eps=layernorm_eps)
    y = linear_act(h, params["w2"], b2, act_fn=None)
    return y.reshape(x_shape)


# --------------------------------------------------------------------- reference
def _ffn_reference(x, params, *, activation_fn, subln, use_bias, layernorm_eps):
    act = _get_activation_fn(activation_fn)
    s = x.shape
    h = x.reshape(-1, s[-1]).astype(jnp.float32)
    h = h @ params["w1"].astype(jnp.float32)
    if use_bias:
        h = h + params["b1"].astype(jnp.float32)
    h = act(h)
    if subln:
        mean = jnp.mean(h, axis=-1, keepdims=True)
        var = jnp.mean((h - mean) ** 2, axis=-1, keepdims=True)
        h = (h - mean) * jax.lax.rsqrt(var + layernorm_eps) * params["ln_w"]
        if use_bias:
            h = h + params["ln_b"]
    y = h @ params["w2"].astype(jnp.float32)
    if use_bias:
        y = y + params["b2"].astype(jnp.float32)
    return y.reshape(s).astype(x.dtype)


# ------------------------------------------------------------------------- main
if __name__ == "__main__":
    batch, seq, embed_dim, ffn_dim = 2, 8, 128, 256
    eps = 1e-6
    dtype = jnp.float32

    key = jax.random.PRNGKey(0)
    kx, k1, k2, k3, k4, k5, k6, k7 = jax.random.split(key, 8)
    x = jax.random.normal(kx, (batch, seq, embed_dim), dtype=dtype)

    scale1 = 1.0 / (embed_dim ** 0.5)
    scale2 = 1.0 / (ffn_dim ** 0.5)

    # ---- Config A: use_bias=True, subln=True -> nn.LayerNorm fused into fc1, swish.
    params_a = {
        "w1": jax.random.normal(k1, (embed_dim, ffn_dim), dtype=dtype) * scale1,
        "b1": jax.random.normal(k2, (ffn_dim,), dtype=dtype) * 0.1,
        "w2": jax.random.normal(k3, (ffn_dim, embed_dim), dtype=dtype) * scale2,
        "b2": jax.random.normal(k4, (embed_dim,), dtype=dtype) * 0.1,
        "ln_w": 1.0 + 0.1 * jax.random.normal(k5, (ffn_dim,), dtype=dtype),
        "ln_b": 0.1 * jax.random.normal(k6, (ffn_dim,), dtype=dtype),
    }
    out_a = feed_forward_network(x, params_a, activation_fn="swish",
                                 subln=True, use_bias=True, layernorm_eps=eps)
    out_a = jax.block_until_ready(out_a)
    ref_a = _ffn_reference(x, params_a, activation_fn="swish",
                           subln=True, use_bias=True, layernorm_eps=eps)
    assert jnp.allclose(out_a, ref_a, atol=2e-4, rtol=2e-4), "config A mismatch"

    # ---- Config B: use_bias=False, subln=True -> UnitLayerNorm path (weight param,
    #      zeros bias buffer skipped), relu activation, no fc biases.
    params_b = {
        "w1": params_a["w1"],
        "b1": jnp.zeros((ffn_dim,), dtype=dtype),
        "w2": params_a["w2"],
        "b2": jnp.zeros((embed_dim,), dtype=dtype),
        "ln_w": jnp.ones((ffn_dim,), dtype=dtype),   # nn.Parameter(torch.ones(...))
        "ln_b": jnp.zeros((ffn_dim,), dtype=dtype),  # registered zeros buffer
    }
    out_b = feed_forward_network(x, params_b, activation_fn="relu",
                                 subln=True, use_bias=False, layernorm_eps=eps)
    out_b = jax.block_until_ready(out_b)
    ref_b = _ffn_reference(x, params_b, activation_fn="relu",
                           subln=True, use_bias=False, layernorm_eps=eps)
    assert jnp.allclose(out_b, ref_b, atol=2e-4, rtol=2e-4), "config B mismatch"

    # ---- Config C: subln=False (no LN), swish, biases.
    out_c = feed_forward_network(x, params_a, activation_fn="swish",
                                 subln=False, use_bias=True, layernorm_eps=eps)
    out_c = jax.block_until_ready(out_c)
    ref_c = _ffn_reference(x, params_a, activation_fn="swish",
                           subln=False, use_bias=True, layernorm_eps=eps)
    assert jnp.allclose(out_c, ref_c, atol=2e-4, rtol=2e-4), "config C mismatch"

    # ---- Standalone LN kernel (fallback path) sanity check.
    h_test = jax.random.normal(k7, (batch * seq, ffn_dim), dtype=dtype)
    ln_out = jax.block_until_ready(
        layer_norm(h_test, params_a["ln_w"], params_a["ln_b"], eps=eps))
    mean = jnp.mean(h_test, axis=-1, keepdims=True)
    var = jnp.mean((h_test - mean) ** 2, axis=-1, keepdims=True)
    ln_ref = (h_test - mean) * jax.lax.rsqrt(var + eps) * params_a["ln_w"] + params_a["ln_b"]
    assert jnp.allclose(ln_out, ln_ref, atol=2e-4, rtol=2e-4), "layer_norm mismatch"

    print("KERNEL_OK")
</pallas_src>

<mosaic_0001>
module attributes {stable_mosaic.version = 11 : i64} {
  func.func @kernel(%arg0: i32, %arg1: i32, %arg2: i32, %arg3: memref<16x128xf32, #tpu.memory_space<vmem>>, %arg4: memref<128x256xf32, #tpu.memory_space<vmem>>, %arg5: memref<1x256xf32, #tpu.memory_space<vmem>>, %arg6: memref<1x256xf32, #tpu.memory_space<vmem>>, %arg7: memref<1x256xf32, #tpu.memory_space<vmem>>, %arg8: memref<16x256xf32, #tpu.memory_space<vmem>>) attributes {dimension_semantics = [#tpu.dimension_semantics<parallel>, #tpu.dimension_semantics<parallel>, #tpu.dimension_semantics<arbitrary>], iteration_bounds = array<i64: 1, 1, 1>, scalar_prefetch = 0 : i64, scratch_operands = 0 : i64, tpu.core_type = #tpu.core_type<tc>, window_params = [{transform_indices = @transform_0, window_bounds = array<i64: 16, 128>}, {transform_indices = @transform_1, window_bounds = array<i64: 128, 256>}, {transform_indices = @transform_2, window_bounds = array<i64: 1, 256>}, {transform_indices = @transform_3, window_bounds = array<i64: 1, 256>}, {transform_indices = @transform_4, window_bounds = array<i64: 1, 256>}, {transform_indices = @transform_5, window_bounds = array<i64: 16, 256>}]} {
    %c0_i32 = arith.constant 0 : i32
    %0 = arith.cmpi eq, %arg2, %c0_i32 : i32
    %1 = arith.extui %0 : i1 to i32
    %c0_i32_0 = arith.constant 0 : i32
    %2 = arith.cmpi ne, %1, %c0_i32_0 : i32
    scf.if %2 {
      %cst_10 = arith.constant 0.000000e+00 : f32
      %12 = vector.broadcast %cst_10 : f32 to vector<16x256xf32>
      %c0_11 = arith.constant 0 : index
      %c0_12 = arith.constant 0 : index
      %13 = vector.load %arg8[%c0_11, %c0_12] : memref<16x256xf32, #tpu.memory_space<vmem>>, vector<16x256xf32>
      tpu.vector_store %arg8[%c0_11, %c0_12], %12 {strides = array<i32>} : memref<16x256xf32, #tpu.memory_space<vmem>>, vector<16x256xf32>,
    } else {
    }
    %c0 = arith.constant 0 : index
    %c0_1 = arith.constant 0 : index
    %3 = vector.load %arg8[%c0, %c0_1] : memref<16x256xf32, #tpu.memory_space<vmem>>, vector<16x256xf32>
    %c0_2 = arith.constant 0 : index
    %c0_3 = arith.constant 0 : index
    %4 = vector.load %arg3[%c0_2, %c0_3] : memref<16x128xf32, #tpu.memory_space<vmem>>, vector<16x128xf32>
    %c0_4 = arith.constant 0 : index
    %c0_5 = arith.constant 0 : index
    %5 = vector.load %arg4[%c0_4, %c0_5] : memref<128x256xf32, #tpu.memory_space<vmem>>, vector<128x256xf32>
    %cst = arith.constant dense<0.000000e+00> : vector<16x256xf32>
    %6 = tpu.matmul %4, %5, %cst {dimension_numbers = #tpu.dot_dimension_numbers<[1], [0], [0], [1], [0, 0, 1, 1], [], []>} : vector<16x128xf32>, vector<128x256xf32>, vector<16x256xf32> -> vector<16x256xf32>
    %7 = arith.addf %3, %6 : vector<16x256xf32>
    %c0_6 = arith.constant 0 : index
    %c0_7 = arith.constant 0 : index
    %8 = vector.load %arg8[%c0_6, %c0_7] : memref<16x256xf32, #tpu.memory_space<vmem>>, vector<16x256xf32>
    tpu.vector_store %arg8[%c0_6, %c0_7], %7 {strides = array<i32>} : memref<16x256xf32, #tpu.memory_space<vmem>>, vector<16x256xf32>,
    %c0_i32_8 = arith.constant 0 : i32
    %9 = arith.cmpi eq, %arg2, %c0_i32_8 : i32
    %10 = arith.extui %9 : i1 to i32
    %c0_i32_9 = arith.constant 0 : i32
    %11 = arith.cmpi ne, %10, %c0_i32_9 : i32
    scf.if %11 {
      %c0_10 = arith.constant 0 : index
      %c0_11 = arith.constant 0 : index
      %12 = vector.load %arg8[%c0_10, %c0_11] : memref<16x256xf32, #tpu.memory_space<vmem>>, vector<16x256xf32>
      %c0_12 = arith.constant 0 : index
      %c0_13 = arith.constant 0 : index
      %13 = vector.load %arg5[%c0_12, %c0_13] : memref<1x256xf32, #tpu.memory_space<vmem>>, vector<1x256xf32>
      %14 = vector.broadcast %13 : vector<1x256xf32> to vector<16x256xf32>
      %15 = arith.addf %12, %14 : vector<16x256xf32>
      %16 = arith.negf %15 : vector<16x256xf32>
      %17 = math.exp %16 : vector<16x256xf32>
      %cst_14 = arith.constant 1.000000e+00 : f32
      %18 = vector.broadcast %cst_14 : f32 to vector<16x256xf32>
      %19 = arith.addf %18, %17 : vector<16x256xf32>
      %20 = arith.divf %18, %19 : vector<16x256xf32>
      %21 = arith.mulf %15, %20 : vector<16x256xf32>
      %cst_15 = arith.constant dense<0.000000e+00> : vector<16xf32>
      %22 = vector.multi_reduction <add>, %21, %cst_15 [1] : vector<16x256xf32> to vector<16xf32>
      %23 = vector.shape_cast %22 : vector<16xf32> to vector<16x1xf32>
      %cst_16 = arith.constant 2.560000e+02 : f32
      %24 = vector.broadcast %cst_16 : f32 to vector<16x1xf32>
      %25 = arith.divf %23, %24 : vector<16x1xf32>
      %26 = vector.broadcast %25 : vector<16x1xf32> to vector<16x256xf32>
      %27 = arith.subf %21, %26 : vector<16x256xf32>
      %28 = arith.mulf %27, %27 : vector<16x256xf32>
      %cst_17 = arith.constant dense<0.000000e+00> : vector<16xf32>
      %29 = vector.multi_reduction <add>, %28, %cst_17 [1] : vector<16x256xf32> to vector<16xf32>
      %30 = vector.shape_cast %29 : vector<16xf32> to vector<16x1xf32>
      %cst_18 = arith.constant 2.560000e+02 : f32
      %31 = vector.broadcast %cst_18 : f32 to vector<16x1xf32>
      %32 = arith.divf %30, %31 : vector<16x1xf32>
      %cst_19 = arith.constant 9.99999997E-7 : f32
      %33 = vector.broadcast %cst_19 : f32 to vector<16x1xf32>
      %34 = arith.addf %32, %33 : vector<16x1xf32>
      %35 = math.rsqrt %34 : vector<16x1xf32>
      %36 = vector.broadcast %35 : vector<16x1xf32> to vector<16x256xf32>
      %37 = arith.mulf %27, %36 : vector<16x256xf32>
      %c0_20 = arith.constant 0 : index
      %c0_21 = arith.constant 0 : index
      %38 = vector.load %arg6[%c0_20, %c0_21] : memref<1x256xf32, #tpu.memory_space<vmem>>, vector<1x256xf32>
      %39 = vector.broadcast %38 : vector<1x256xf32> to vector<16x256xf32>
      %40 = arith.mulf %37, %39 : vector<16x256xf32>
      %c0_22 = arith.constant 0 : index
      %c0_23 = arith.constant 0 : index
      %41 = vector.load %arg7[%c0_22, %c0_23] : memref<1x256xf32, #tpu.memory_space<vmem>>, vector<1x256xf32>
      %42 = vector.broadcast %41 : vector<1x256xf32> to vector<16x256xf32>
      %43 = arith.addf %40, %42 : vector<16x256xf32>
      %c0_24 = arith.constant 0 : index
      %c0_25 = arith.constant 0 : index
      %44 = vector.load %arg8[%c0_24, %c0_25] : memref<16x256xf32, #tpu.memory_space<vmem>>, vector<16x256xf32>
      tpu.vector_store %arg8[%c0_24, %c0_25], %43 {strides = array<i32>} : memref<16x256xf32, #tpu.memory_space<vmem>>, vector<16x256xf32>,
    } else {
    }
    return
  }
  func.func @transform_0(%arg0: i32, %arg1: i32, %arg2: i32) -> (i32, i32) {
    %c0_i32 = arith.constant 0 : i32
    return %arg0, %arg2 : i32, i32
  }
  func.func @transform_1(%arg0: i32, %arg1: i32, %arg2: i32) -> (i32, i32) {
    %c0_i32 = arith.constant 0 : i32
    return %arg2, %arg1 : i32, i32
  }
  func.func @transform_2(%arg0: i32, %arg1: i32, %arg2: i32) -> (i32, i32) {
    %c0_i32 = arith.constant 0 : i32
    %c0_i32_0 = arith.constant 0 : i32
    return %c0_i32, %arg1 : i32, i32
  }
  func.func @transform_3(%arg0: i32, %arg1: i32, %arg2: i32) -> (i32, i32) {
    %c0_i32 = arith.constant 0 : i32
    %c0_i32_0 = arith.constant 0 : i32
    return %c0_i32, %arg1 : i32, i32
  }
  func.func @transform_4(%arg0: i32, %arg1: i32, %arg2: i32) -> (i32, i32) {
    %c0_i32 = arith.constant 0 : i32
    %c0_i32_0 = arith.constant 0 : i32
    return %c0_i32, %arg1 : i32, i32
  }
  func.func @transform_5(%arg0: i32, %arg1: i32, %arg2: i32) -> (i32, i32) {
    %c0_i32 = arith.constant 0 : i32
    return %arg0, %arg1 : i32, i32
  }
}

</mosaic_0001>

<bundles_post_ra>
// kernel: tpu_custom_call.1
= control target key start
LH: loop header
LB: loop body
LE: loop exit
PB: predicated region body
PF: predicated region fallthrough
CT: control target
= control target key end

     0   :  { %10 = vsyncpa [#allocation3], 0  ;;  %s569_s0 = inlined_call_operand.hbm [shape: f32[16,128], index: 0, kind: input, shape index: {}]   ;;  %s570_s1 = inlined_call_operand.hbm [shape: f32[128,256], index: 1, kind: input, shape index: {}]   ;;  %s571_s2 = inlined_call_operand.vmem [shape: f32[1,256], index: 2, kind: input, shape index: {}]   ;;  %s572_s3 = inlined_call_operand.vmem [shape: f32[1,256], index: 3, kind: input, shape index: {}]   ;;  %s573_s4 = inlined_call_operand.vmem [shape: f32[1,256], index: 4, kind: input, shape index: {}]   ;;  %s574_s5 = inlined_call_operand.hbm [shape: f32[16,256], index: 5, kind: output, shape index: {}]  }
   0x1   :  { %11 = vsyncpa [#allocation6], 0 }
   0x2   :  { %12 = vsyncpa [#allocation4], 0  ;;  %s470_s18 = smov [#allocation2]   ;;  %s398_s22 = scalar_lea.hbm %s569_s0, 256 }
   0x3   :  { %s18_s19 = sshll.u32 %s470_s18, 4  ;;  %p399_p0 = scmp.ne.s32.totalorder %s569_s0, %s398_s22  ;;  %s19_s19 = int_to_ptr.vmem [resolvable:$true] %s18_s19 }
   0x4   :  { %p402_p1 = scmp.lt.u32.totalorder %s398_s22, %s569_s0 }
   0x6   :  { %p404_p2 = pnand %p402_p1, %p399_p0 }
   0x8   :  { %407 = shalt.err (!%p404_p2)
}
   0x9   :  { %s408_s27 = scalar_lea.vmem %s19_s19, 256  ;;  %p413_p4 = scmp.lt.s32.totalorder %s19_s19, %s19_s19 }
   0xa   :  { %p409_p3 = scmp.ne.s32.totalorder %s19_s19, %s408_s27  ;;  %p414_p5 = scmp.lt.s32.totalorder %s408_s27, %s408_s27 }
   0xc   :  { %p415_p6 = por %p414_p5, %p413_p4 }
   0xe   :  { %p416_p7 = pnand %p415_p6, %p409_p3 }
  0x10   :  { %419 = shalt.err (!%p416_p7)
}
  0x11   :  { %s471_s28 = smov 128   ;;  %s472_s29 = smov 8  }
  0x12   :  { %24 = dma.hbm_to_vmem [thread:$0]  %s569_s0, 256, %s19_s19, [#allocation3], %s471_s28, %s471_s28, %s472_s29  }
  0x13   :  { %s473_s7 = smov [#allocation5]   ;;  %s420_s11 = scalar_lea.hbm %s570_s1, 4096 }
  0x14   :  { %s30_s8 = sshll.u32 %s473_s7, 4  ;;  %p421_p8 = scmp.ne.s32.totalorder %s570_s1, %s420_s11  ;;  %s31_s8 = int_to_ptr.vmem [resolvable:$true] %s30_s8 }
  0x15   :  { %p424_p9 = scmp.lt.u32.totalorder %s420_s11, %s570_s1 }
  0x17   :  { %p426_p10 = pnand %p424_p9, %p421_p8 }
  0x19   :  { %429 = shalt.err (!%p426_p10)
}
  0x1a   :  { %s430_s16 = scalar_lea.vmem %s31_s8, 4096  ;;  %p435_p12 = scmp.lt.s32.totalorder %s31_s8, %s31_s8 }
  0x1b   :  { %p431_p11 = scmp.ne.s32.totalorder %s31_s8, %s430_s16  ;;  %p436_p13 = scmp.lt.s32.totalorder %s430_s16, %s430_s16 }
  0x1d   :  { %p437_p0 = por %p436_p13, %p435_p12 }
  0x1f   :  { %p438_p1 = pnand %p437_p0, %p431_p11 }
  0x21   :  { %441 = shalt.err (!%p438_p1)
}
  0x22   :  { %s474_s0 = smov 256   ;;  %s475_s17 = smov 16  }
  0x23   :  { %36 = dma.hbm_to_vmem [thread:$0]  %s570_s1, 4096, %s31_s8, [#allocation6], %s474_s0, %s474_s0, %s475_s17  }
  0x24   :  { %464 = dma.done.wait [#allocation3], 256  }
  0x25   :  { %465 = vsyncadd [#allocation3], 4294967040 }
  0x26   :  { %466 = dma.done.wait [#allocation6], 4096  }
  0x27   :  { %467 = vsyncadd [#allocation6], 4294963200  ;;  %v476_v0 = vmov 0.0   ;;  %v64_v1 = vld [vmem:[#allocation5 + $0x8] sm:$0xff]  ;;  %v66_v2 = vld [vmem:[#allocation5 + $0x18] sm:$0xff]  ;;  %v189_v51 = vlaneseq }
  0x28   :  { %159 = vmatprep.mubr.f32.mxu0 %v476_v0  ;;  %165 = vmatprep.mubr.f32.mxu1 %v476_v0  ;;  %v63_v3 = vld [vmem:[#allocation5] sm:$0xff]  ;;  %v322_v4 = vpack.c.bf16 %v66_v2, %v64_v1  ;;  %v65_v5 = vld [vmem:[#allocation5 + $0x10] sm:$0xff]  ;;  %v68_v6 = vld [vmem:[#allocation5 + $0x28] sm:$0xff] }
  0x29   :  { %v70_v7 = vld [vmem:[#allocation5 + $0x38] sm:$0xff]  ;;  %v324_v8 = vpack.c.bf16 %v65_v5, %v63_v3  ;;  %v67_v10 = vld [vmem:[#allocation5 + $0x20] sm:$0xff]  ;;  %v69_v11 = vld [vmem:[#allocation5 + $0x30] sm:$0xff]  ;;  %v190_v52 = vshrl.u32 %v189_v51, 7 }
  0x2a   :  { %v326_v9 = vpack.c.bf16 %v70_v7, %v68_v6  ;;  %v72_v12 = vld [vmem:[#allocation5 + $0x48] sm:$0xff]  ;;  %323 = vmatprep.subr.bf16.mxu0 %v322_v4  ;;  %354 = vmatprep.subr.bf16.mxu1 %v322_v4  ;;  %v74_v13 = vld [vmem:[#allocation5 + $0x58] sm:$0xff]  ;;  %v328_v14 = vpack.c.bf16 %v69_v11, %v67_v10  ;;  %v71_v16 = vld [vmem:[#allocation5 + $0x40] sm:$0xff] }
  0x2b   :  { %325 = vmatpush1.bf16.msra.mxu0 %v324_v8  ;;  %362 = vmatpush1.bf16.msra.mxu1 %v324_v8  ;;  %v330_v15 = vpack.c.bf16 %v74_v13, %v72_v12  ;;  %v73_v17 = vld [vmem:[#allocation5 + $0x50] sm:$0xff]  ;;  %v76_v18 = vld [vmem:[#allocation5 + $0x68] sm:$0xff]  ;;  %v78_v19 = vld [vmem:[#allocation5 + $0x78] sm:$0xff]  ;;  %v535_v53 = vsub.s32 0, %v190_v52  ;;  %v540_v55 = vsub.s32 1, %v190_v52 }
  0x2c   :  { %327 = vmatprep.subr.bf16.mxu0 %v326_v9  ;;  %355 = vmatprep.subr.bf16.mxu1 %v326_v9  ;;  %v332_v20 = vpack.c.bf16 %v73_v17, %v71_v16  ;;  %v334_v21 = vpack.c.bf16 %v78_v19, %v76_v18  ;;  %v75_v22 = vld [vmem:[#allocation5 + $0x60] sm:$0xff]  ;;  %v77_v23 = vld [vmem:[#allocation5 + $0x70] sm:$0xff]  ;;  %v80_v24 = vld [vmem:[#allocation5 + $0x88] sm:$0xff] }
  0x2d   :  { %v82_v25 = vld [vmem:[#allocation5 + $0x98] sm:$0xff]  ;;  %v336_v26 = vpack.c.bf16 %v77_v23, %v75_v22  ;;  %v79_v28 = vld [vmem:[#allocation5 + $0x80] sm:$0xff]  ;;  %v81_v29 = vld [vmem:[#allocation5 + $0x90] sm:$0xff] }
  0x2e   :  { %v338_v27 = vpack.c.bf16 %v82_v25, %v80_v24  ;;  %v84_v30 = vld [vmem:[#allocation5 + $0xa8] sm:$0xff]  ;;  %v86_v31 = vld [vmem:[#allocation5 + $0xb8] sm:$0xff]  ;;  %v340_v32 = vpack.c.bf16 %v81_v29, %v79_v28  ;;  %v83_v34 = vld [vmem:[#allocation5 + $0xa0] sm:$0xff] }
  0x2f   :  { %329 = vmatpush1.bf16.msra.mxu0 %v328_v14  ;;  %363 = vmatpush1.bf16.msra.mxu1 %v328_v14  ;;  %v342_v33 = vpack.c.bf16 %v86_v31, %v84_v30  ;;  %v85_v35 = vld [vmem:[#allocation5 + $0xb0] sm:$0xff]  ;;  %v88_v36 = vld [vmem:[#allocation5 + $0xc8] sm:$0xff]  ;;  %v90_v37 = vld [vmem:[#allocation5 + $0xd8] sm:$0xff] }
  0x30   :  { %331 = vmatprep.subr.bf16.mxu0 %v330_v15  ;;  %356 = vmatprep.subr.bf16.mxu1 %v330_v15  ;;  %v344_v38 = vpack.c.bf16 %v85_v35, %v83_v34  ;;  %v346_v39 = vpack.c.bf16 %v90_v37, %v88_v36  ;;  %v87_v40 = vld [vmem:[#allocation5 + $0xc0] sm:$0xff]  ;;  %v89_v41 = vld [vmem:[#allocation5 + $0xd0] sm:$0xff]  ;;  %v92_v42 = vld [vmem:[#allocation5 + $0xe8] sm:$0xff] }
  0x31   :  { %v94_v43 = vld [vmem:[#allocation5 + $0xf8] sm:$0xff]  ;;  %v348_v44 = vpack.c.bf16 %v89_v41, %v87_v40  ;;  %v91_v46 = vld [vmem:[#allocation5 + $0xe0] sm:$0xff]  ;;  %v93_v47 = vld [vmem:[#allocation5 + $0xf0] sm:$0xff] }
  0x32   :  { %v350_v45 = vpack.c.bf16 %v94_v43, %v92_v42  ;;  %v352_v48 = vpack.c.bf16 %v93_v47, %v91_v46  ;;  %v61_v49 = vld [vmem:[#allocation2] sm:$0xff]  ;;  %v62_v50 = vld [vmem:[#allocation2 + $0x8] sm:$0xff] }
  0x33   :  { %333 = vmatpush1.bf16.msra.mxu0 %v332_v20  ;;  %364 = vmatpush1.bf16.msra.mxu1 %v332_v20  ;;  %v187_v54 = vld [vmem:[%s571_s2] sm:$0x3] }
  0x34   :  { %335 = vmatprep.subr.bf16.mxu0 %v334_v21  ;;  %357 = vmatprep.subr.bf16.mxu1 %v334_v21  ;;  %v192_v56 = vrot.slane %v187_v54, %v535_v53  ;;  %v196_v59 = vrot.slane %v187_v54, %v540_v55 }
  0x37   :  { %337 = vmatpush1.bf16.msra.mxu0 %v336_v26  ;;  %365 = vmatpush1.bf16.msra.mxu1 %v336_v26 }
  0x38   :  { %339 = vmatprep.subr.bf16.mxu0 %v338_v27  ;;  %358 = vmatprep.subr.bf16.mxu1 %v338_v27 }
  0x3b   :  { %341 = vmatpush1.bf16.msra.mxu0 %v340_v32  ;;  %366 = vmatpush1.bf16.msra.mxu1 %v340_v32 }
  0x3c   :  { %343 = vmatprep.subr.bf16.mxu0 %v342_v33  ;;  %359 = vmatprep.subr.bf16.mxu1 %v342_v33 }
  0x3f   :  { %345 = vmatpush1.bf16.msra.mxu0 %v344_v38  ;;  %367 = vmatpush1.bf16.msra.mxu1 %v344_v38 }
  0x40   :  { %347 = vmatprep.subr.bf16.mxu0 %v346_v39  ;;  %360 = vmatprep.subr.bf16.mxu1 %v346_v39 }
  0x43   :  { %349 = vmatpush1.bf16.msra.mxu0 %v348_v44  ;;  %368 = vmatpush1.bf16.msra.mxu1 %v348_v44  ;;  %v264_v44 = vld [vmem:[%s572_s3] sm:$0x3]  ;;  %s477_s3 = smov [#allocation7]  }
  0x44   :  { %351 = vmatprep.subr.bf16.mxu0 %v350_v45  ;;  %361 = vmatprep.subr.bf16.mxu1 %v350_v45  ;;  %v280_v45 = vld [vmem:[%s573_s4] sm:$0x3]  ;;  %v269_v46 = vrot.slane %v264_v44, %v535_v53  ;;  %v273_v47 = vrot.slane %v264_v44, %v540_v55  ;;  %s305_s4 = sshll.u32 %s477_s3, 4  ;;  %s306_s4 = int_to_ptr.vmem [resolvable:$true] %s305_s4 }
  0x45   :  { %s442_s24 = scalar_lea.vmem %s306_s4, 512  ;;  %p447_p3 = scmp.lt.s32.totalorder %s306_s4, %s306_s4 }
  0x46   :  { %p443_p2 = scmp.ne.s32.totalorder %s306_s4, %s442_s24  ;;  %p448_p4 = scmp.lt.s32.totalorder %s442_s24, %s442_s24 }
  0x47   :  { %353 = vmatpush1.bf16.msra.mxu0 %v352_v48  ;;  %369 = vmatpush1.bf16.msra.mxu1 %v352_v48 }
  0x48   :  { %p449_p5 = por %p448_p4, %p447_p3 }
  0x4a   :  { %160 = vmatmul.mubr.f32.vlgmr.msra.gmra.mrb[0].mxu0 %v61_v49  ;;  %166 = vmatmul.mubr.f32.vlgmr.msra.gmra.mrb[0].mxu1 %v62_v50  ;;  %v285_v49 = vrot.slane %v280_v45, %v535_v53  ;;  %v289_v50 = vrot.slane %v280_v45, %v540_v55  ;;  %p450_p6 = pnand %p449_p5, %p443_p2 }
 0x11d   :  { %v161_v57 = vpop.f32.mrb[0].mxu0  ;;  %v167_v58 = vpop.f32.mrb[0].mxu1 }
 0x11e   :  { %v163_v60 = vpop.f32.mrb[1].mxu0  ;;  %v169_v61 = vpop.f32.mrb[1].mxu1  ;;  %v199_v62 = vadd.f32 %v192_v56, %v161_v57  ;;  %v201_v63 = vadd.f32 %v192_v56, %v167_v58 }
 0x11f   :  { %v200_v0 = vadd.f32 %v196_v59, %v163_v60  ;;  %v202_v1 = vadd.f32 %v196_v59, %v169_v61 }
 0x120   :  { %v318_v2 = vmul.f32 -1.442695, %v199_v62  ;;  %v320_v3 = vmul.f32 -1.442695, %v201_v63 }
 0x121   :  { %v319_v4 = vmul.f32 -1.442695, %v200_v0  ;;  %v321_v5 = vmul.f32 -1.442695, %v202_v1 }
 0x122   :  { %378 = vpow2.f32 %v318_v2 }
 0x123   :  { %380 = vpow2.f32 %v319_v4 }
 0x124   :  { %382 = vpow2.f32 %v320_v3 }
 0x125   :  { %384 = vpow2.f32 %v321_v5 }
 0x12c   :  { %v379_v6 = vpop.eup %378 }
 0x12d   :  { %v381_v7 = vpop.eup %380  ;;  %v215_v8 = vadd.f32 1.0, %v379_v6 }
 0x12e   :  { %v383_v9 = vpop.eup %382  ;;  %v216_v10 = vadd.f32 1.0, %v381_v7 }
 0x12f   :  { %v385_v11 = vpop.eup %384  ;;  %386 = vrcp.f32 %v215_v8  ;;  %v217_v12 = vadd.f32 1.0, %v383_v9 }
 0x130   :  { %388 = vrcp.f32 %v216_v10  ;;  %v218_v13 = vadd.f32 1.0, %v385_v11 }
 0x131   :  { %390 = vrcp.f32 %v217_v12 }
 0x132   :  { %392 = vrcp.f32 %v218_v13 }
 0x139   :  { %v387_v14 = vpop.eup %386 }
 0x13a   :  { %v389_v15 = vpop.eup %388  ;;  %v227_v16 = vmul.f32 %v387_v14, %v199_v62 }
 0x13b   :  { %v391_v17 = vpop.eup %390  ;;  %v228_v18 = vmul.f32 %v389_v15, %v200_v0 }
 0x13c   :  { %v393_v19 = vpop.eup %392  ;;  %v229_v21 = vmul.f32 %v391_v17, %v201_v63 }
 0x13d   :  { %v231_v20 = vadd.f32 %v228_v18, %v227_v16  ;;  %v230_v22 = vmul.f32 %v393_v19, %v202_v1 }
 0x13f   :  { %232 = vadd.xlane.f32.xlu0 %v231_v20  ;;  %v234_v23 = vadd.f32 %v230_v22, %v229_v21 }
 0x143   :  { %235 = vadd.xlane.f32.xlu0 %v234_v23 }
 0x1cc   :  { %v233_v24 = vpop.xlane.xlu0 %232 }
 0x1cd   :  { %v238_v25 = vmul.f32 0.00390625, %v233_v24 }
 0x1cf   :  { %v240_v26 = vsub.f32 %v227_v16, %v238_v25  ;;  %v241_v27 = vsub.f32 %v228_v18, %v238_v25 }
 0x1d0   :  { %v236_v28 = vpop.xlane.xlu0 %235 }
 0x1d1   :  { %v239_v29 = vmul.f32 0.00390625, %v236_v28  ;;  %v244_v30 = vmul.f32 %v240_v26, %v240_v26  ;;  %v245_v31 = vmul.f32 %v241_v27, %v241_v27 }
 0x1d3   :  { %v242_v32 = vsub.f32 %v229_v21, %v239_v29  ;;  %v243_v33 = vsub.f32 %v230_v22, %v239_v29  ;;  %v248_v34 = vadd.f32 %v245_v31, %v244_v30 }
 0x1d5   :  { %249 = vadd.xlane.f32.xlu1 %v248_v34  ;;  %v246_v35 = vmul.f32 %v242_v32, %v242_v32  ;;  %v247_v36 = vmul.f32 %v243_v33, %v243_v33 }
 0x1d7   :  { %v251_v37 = vadd.f32 %v247_v36, %v246_v35 }
 0x1d9   :  { %252 = vadd.xlane.f32.xlu1 %v251_v37 }
 0x262   :  { %v250_v38 = vpop.xlane.xlu1 %249 }
 0x263   :  { %v254_v39 = vmul.f32 0.00390625, %v250_v38 }
 0x265   :  { %v256_v40 = vadd.f32 1e-06, %v254_v39 }
 0x266   :  { %v253_v41 = vpop.xlane.xlu1 %252 }
 0x267   :  { %394 = vrsqrt.f32 %v256_v40  ;;  %v255_v42 = vmul.f32 0.00390625, %v253_v41 }
 0x269   :  { %v257_v43 = vadd.f32 1e-06, %v255_v42 }
 0x26b   :  { %396 = vrsqrt.f32 %v257_v43 }
 0x271   :  { %v395_v48 = vpop.eup %394 }
 0x272   :  { %v260_v51 = vmul.f32 %v395_v48, %v240_v26  ;;  %v261_v52 = vmul.f32 %v395_v48, %v241_v27 }
 0x274   :  { %v276_v54 = vmul.f32 %v269_v46, %v260_v51  ;;  %v277_v56 = vmul.f32 %v273_v47, %v261_v52 }
 0x275   :  { %v397_v57 = vpop.eup %396 }
 0x276   :  { %v262_v58 = vmul.f32 %v397_v57, %v242_v32  ;;  %v263_v59 = vmul.f32 %v397_v57, %v243_v33  ;;  %v292_v60 = vadd.f32 %v285_v49, %v276_v54  ;;  %v293_v61 = vadd.f32 %v289_v50, %v277_v56 }
 0x278   :  { %v278_v62 = vmul.f32 %v269_v46, %v262_v58  ;;  %v279_v63 = vmul.f32 %v273_v47, %v263_v59  ;;  %296 = vst [vmem:[#allocation7] sm:$0xff] %v292_v60  ;;  %297 = vst [vmem:[#allocation7 + $0x8] sm:$0xff] %v293_v61 }
 0x27a   :  { %v294_v0 = vadd.f32 %v285_v49, %v278_v62  ;;  %v295_v1 = vadd.f32 %v289_v50, %v279_v63 }
 0x27c   :  { %298 = vst [vmem:[#allocation7 + $0x10] sm:$0xff] %v294_v0  ;;  %299 = vst [vmem:[#allocation7 + $0x18] sm:$0xff] %v295_v1 }
 0x27d   :  { %453 = shalt.err (!%p450_p6)
}
 0x27e   :  { %s454_s27 = scalar_lea.hbm %s574_s5, 512 }
 0x27f   :  { %p455_p7 = scmp.ne.s32.totalorder %s574_s5, %s454_s27  ;;  %p458_p8 = scmp.lt.u32.totalorder %s454_s27, %s574_s5 }
 0x281   :  { %p460_p9 = pnand %p458_p8, %p455_p7 }
 0x283   :  { %463 = shalt.err (!%p460_p9)
}
 0x284   :  { %311 = dma.vmem_to_hbm [thread:$0]  %s306_s4, 512, %s574_s5, [#allocation4], %s474_s0, %s474_s0, %s475_s17  }
 0x285   :  { %468 = dma.done.wait [#allocation4], 512  }
 0x286   :  { %469 = vsyncadd [#allocation4], 4294966784 }
 0x287   :  { %315 = vsyncpa [#allocation3], 1 }
 0x288   :  { %316 = vsyncpa [#allocation6], 1 }
 0x289   :  { %317 = vsyncpa [#allocation4], 1 }

</bundles_post_ra>
